<compile_context>
chip_gen: v6e
topology: v6e:2x2x1
jax: 0.10.0
libtpu: 0.0.40
codegen_flags: <defaults>
</compile_context>

<pallas_src>
import functools

import jax
import jax.numpy as jnp
import numpy as np
from jax.experimental import pallas as pl
from jax.experimental.pallas import tpu as pltpu


# ---------------------------------------------------------------------------
# Fused Pallas kernel: stacked tanh-RNN over all timesteps (batch row S-1 only)
# + linear head, all in one launch.
# ---------------------------------------------------------------------------
def _fused_rnn_head_kernel(x_ref, wih0_ref, wihr_ref, whh_ref, b_ref,
                           wlin_ref, blin_ref, out_ref, *, num_layers, seq_len):
    """
    x_ref:    (T, S*I)      f32   raw input rows (the module's flat .view layout)
    wih0_ref: (I, H)        bf16  layer-0 W_ih^T
    wihr_ref: (max(L-1,1), H, H)  bf16  W_ih^T for layers 1..L-1
    whh_ref:  (L, H, H)     bf16  W_hh^T per layer
    b_ref:    (L, 1, H)     f32   b_ih + b_hh per layer
    wlin_ref: (H, O)        bf16  Linear weight^T
    blin_ref: (1, O)        f32   Linear bias
    out_ref:  (1, O)        f32   = Linear(rnn_out[T-1, S-1])  (== preds[-1])
    """
    T, F = x_ref.shape
    L = num_layers
    S = seq_len
    I = F // S
    H = whh_ref.shape[-1]

    # ---- one-time loads, hoisted out of the unrolled (t, l) loops ----
    x_all = x_ref[...]                                   # (T, S*I) f32
    wih0 = wih0_ref[...]                                 # (I, H)  bf16
    whh = [whh_ref[l] for l in range(L)]                 # (H, H)  bf16 each
    wih = [None] + [wihr_ref[l - 1] for l in range(1, L)]
    bias = [b_ref[l] for l in range(L)]                  # (1, H)  f32  each
    wlin = wlin_ref[...]                                 # (H, O)  bf16
    blin = blin_ref[...]                                 # (1, O)  f32

    # preds[-1] depends only on batch row S-1 (zero h0, independent batch rows):
    # slice its features once (in-kernel lane slice; no extra wrapper launch).
    x_last = x_all[:, (S - 1) * I: S * I]                # (T, I) f32

    # Pre-project ALL layer-0 input contributions with a single MXU call.
    xw0 = jnp.dot(x_last.astype(jnp.bfloat16), wih0,
                  preferred_element_type=jnp.float32)    # (T, H) f32

    # Hidden state lives in f32 vregs; only MXU LHS operands are cast to bf16.
    h = [jnp.zeros((1, H), jnp.float32) for _ in range(L)]

    layer_in = h[0]
    for t in range(T):                                   # static unroll, T*L steps
        # layer 0: input contribution already pre-projected
        pre0 = (xw0[t:t + 1, :]
                + jnp.dot(h[0].astype(jnp.bfloat16), whh[0],
                          preferred_element_type=jnp.float32)
                + bias[0])
        h[0] = jnp.tanh(pre0)
        layer_in = h[0]
        # layers 1..L-1: two small dots instead of a lane concat + one dot
        for l in range(1, L):
            pre = (jnp.dot(layer_in.astype(jnp.bfloat16), wih[l],
                           preferred_element_type=jnp.float32)
                   + jnp.dot(h[l].astype(jnp.bfloat16), whh[l],
                             preferred_element_type=jnp.float32)
                   + bias[l])
            h[l] = jnp.tanh(pre)
            layer_in = h[l]

    # Head on the (1, H) top-layer hidden at t = T-1  ->  preds[-1]
    out_ref[...] = (jnp.dot(layer_in.astype(jnp.bfloat16), wlin,
                            preferred_element_type=jnp.float32)
                    + blin).astype(out_ref.dtype)


# ---------------------------------------------------------------------------
# Wrappers (glue)
# ---------------------------------------------------------------------------
_VMEM_SPEC = pl.BlockSpec(memory_space=pltpu.MemorySpace.VMEM)


def fused_forward_pallas(x, wih0, wihr, whh, b, w_lin, b_lin, *, num_layers, seq_len):
    O = w_lin.shape[1]
    kernel = functools.partial(_fused_rnn_head_kernel,
                               num_layers=num_layers, seq_len=seq_len)
    return pl.pallas_call(
        kernel,
        out_shape=jax.ShapeDtypeStruct((1, O), jnp.float32),
        in_specs=[_VMEM_SPEC] * 7,
        out_specs=_VMEM_SPEC,
    )(x, wih0, wihr, whh, b, w_lin, b_lin)


def prepare_fused_params(params):
    """Cast weights to bf16 (MXU operands); biases stay f32. No concat/stack needed."""
    whh = params["whh"]
    wihr = params["wihr"]
    if wihr.shape[0] == 0:   # num_layers == 1: keep a non-empty dummy array
        wihr = jnp.zeros((1,) + whh.shape[1:], whh.dtype)
    return dict(
        wih0=params["wih0"].astype(jnp.bfloat16),                 # (I, H)
        wihr=wihr.astype(jnp.bfloat16),                           # (L-1, H, H)
        whh=whh.astype(jnp.bfloat16),                             # (L, H, H)
        b=params["b"].astype(jnp.float32),                        # (L, 1, H)
        w_lin=params["w_lin"].astype(jnp.bfloat16),               # (H, O)
        b_lin=params["b_lin"].reshape(1, -1).astype(jnp.float32), # (1, O)
    )


@functools.partial(jax.jit, static_argnames=("sequence_length", "num_layers"))
def my_own_rnn_forward(input_sequence, fused_params, *, sequence_length, num_layers):
    """Mirrors MyOwnRNN.forward: .view(T,S,-1) -> RNN -> Linear(view(S,T,H)[-1]) -> [-1]."""
    T = input_sequence.shape[0]
    x = input_sequence.reshape(T, -1)        # flat .view reinterpretation (free under jit)
    out = fused_forward_pallas(
        x, fused_params["wih0"], fused_params["wihr"], fused_params["whh"],
        fused_params["b"], fused_params["w_lin"], fused_params["b_lin"],
        num_layers=num_layers, seq_len=sequence_length)
    return out.reshape(-1)                   # preds[-1], shape (O,)


# ---------------------------------------------------------------------------
# Pure-JAX f32 reference (full unfused semantics, including the raw .view path)
# ---------------------------------------------------------------------------
def reference_forward(input_sequence, params, *, sequence_length, hidden_size):
    T = input_sequence.shape[0]
    x = input_sequence.reshape(T, sequence_length, -1)
    L = params["whh"].shape[0]
    S, H = sequence_length, hidden_size
    h = jnp.zeros((L, S, H), jnp.float32)
    outs = []
    for t in range(T):
        layer_in = x[t]
        new_h = []
        for l in range(L):
            w_in = params["wih0"] if l == 0 else params["wihr"][l - 1]
            hn = jnp.tanh(layer_in @ w_in + h[l] @ params["whh"][l] + params["b"][l])
            new_h.append(hn)
            layer_in = hn
        h = jnp.stack(new_h)
        outs.append(layer_in)
    rnn_out = jnp.stack(outs)                                # (T, S, H)
    slab = rnn_out.reshape(S, T, H)[-1]                      # raw .view, then [-1]
    preds = slab @ params["w_lin"] + params["b_lin"]
    return preds[-1]


# ---------------------------------------------------------------------------
# Deterministic parameter init (PyTorch-style U(-1/sqrt(H), 1/sqrt(H)))
# ---------------------------------------------------------------------------
def init_params(key, input_size, hidden_size, output_size, num_layers):
    k = 1.0 / np.sqrt(hidden_size)
    keys = jax.random.split(key, 8)
    uni = lambda kk, shape: jax.random.uniform(kk, shape, jnp.float32, -k, k)

    wih0 = uni(keys[0], (input_size, hidden_size))                  # W_ih_l0^T
    wihr = uni(keys[1], (max(num_layers - 1, 1), hidden_size, hidden_size))
    wihr = wihr[: num_layers - 1]                                   # W_ih_l{>0}^T
    whh = uni(keys[2], (num_layers, hidden_size, hidden_size))      # W_hh^T
    b_ih = uni(keys[3], (num_layers, 1, hidden_size))
    b_hh = uni(keys[4], (num_layers, 1, hidden_size))
    b = b_ih + b_hh                                                 # combined bias
    w_lin = uni(keys[5], (hidden_size, output_size))                # Linear weight^T
    b_lin = uni(keys[6], (output_size,))
    return dict(wih0=wih0, wihr=wihr, whh=whh, b=b, w_lin=w_lin, b_lin=b_lin)


# ---------------------------------------------------------------------------
if __name__ == "__main__":
    input_size = 4
    hidden_size = 32
    sequence_length = 8
    output_size = 4
    num_layers = 2
    T = 6  # len(input_sequence)

    key = jax.random.PRNGKey(0)
    k_x, k_p = jax.random.split(key)
    # input_sequence as the module receives it: any shape viewable to (T, S, I)
    x = jax.random.normal(k_x, (T, sequence_length * input_size), jnp.float32)
    params = init_params(k_p, input_size, hidden_size, output_size, num_layers)
    fused = prepare_fused_params(params)

    out = my_own_rnn_forward(x, fused,
                             sequence_length=sequence_length,
                             num_layers=num_layers)
    out = jax.block_until_ready(out)

    ref = reference_forward(x, params,
                            sequence_length=sequence_length,
                            hidden_size=hidden_size)
    np.testing.assert_allclose(np.asarray(out), np.asarray(ref), rtol=2e-2, atol=2e-2)
    assert out.shape == (output_size,)

    print("KERNEL_OK")
</pallas_src>

<mosaic_0001>
module attributes {stable_mosaic.version = 11 : i64} {
  func.func @_fused_rnn_head_kernel(%arg0: memref<6x32xf32, #tpu.memory_space<vmem>>, %arg1: memref<4x32xbf16, #tpu.memory_space<vmem>>, %arg2: memref<1x32x32xbf16, #tpu.memory_space<vmem>>, %arg3: memref<2x32x32xbf16, #tpu.memory_space<vmem>>, %arg4: memref<2x1x32xf32, #tpu.memory_space<vmem>>, %arg5: memref<32x4xbf16, #tpu.memory_space<vmem>>, %arg6: memref<1x4xf32, #tpu.memory_space<vmem>>, %arg7: memref<1x4xf32, #tpu.memory_space<vmem>>) attributes {dimension_semantics = [], scalar_prefetch = 0 : i64, scratch_operands = 0 : i64, tpu.core_type = #tpu.core_type<tc>} {
    %c0 = arith.constant 0 : index
    %c0_0 = arith.constant 0 : index
    %0 = vector.load %arg0[%c0, %c0_0] : memref<6x32xf32, #tpu.memory_space<vmem>>, vector<6x32xf32>
    %c0_1 = arith.constant 0 : index
    %c0_2 = arith.constant 0 : index
    %1 = vector.load %arg1[%c0_1, %c0_2] : memref<4x32xbf16, #tpu.memory_space<vmem>>, vector<4x32xbf16>
    %c0_3 = arith.constant 0 : index
    %c0_4 = arith.constant 0 : index
    %c0_5 = arith.constant 0 : index
    %2 = vector.load %arg3[%c0_3, %c0_4, %c0_5] : memref<2x32x32xbf16, #tpu.memory_space<vmem>>, vector<1x32x32xbf16>
    %3 = vector.shape_cast %2 : vector<1x32x32xbf16> to vector<32x32xbf16>
    %c1 = arith.constant 1 : index
    %c0_6 = arith.constant 0 : index
    %c0_7 = arith.constant 0 : index
    %4 = vector.load %arg3[%c1, %c0_6, %c0_7] : memref<2x32x32xbf16, #tpu.memory_space<vmem>>, vector<1x32x32xbf16>
    %5 = vector.shape_cast %4 : vector<1x32x32xbf16> to vector<32x32xbf16>
    %c0_8 = arith.constant 0 : index
    %c0_9 = arith.constant 0 : index
    %c0_10 = arith.constant 0 : index
    %6 = vector.load %arg2[%c0_8, %c0_9, %c0_10] : memref<1x32x32xbf16, #tpu.memory_space<vmem>>, vector<1x32x32xbf16>
    %7 = vector.shape_cast %6 : vector<1x32x32xbf16> to vector<32x32xbf16>
    %c0_11 = arith.constant 0 : index
    %c0_12 = arith.constant 0 : index
    %c0_13 = arith.constant 0 : index
    %8 = vector.load %arg4[%c0_11, %c0_12, %c0_13] : memref<2x1x32xf32, #tpu.memory_space<vmem>>, vector<1x1x32xf32>
    %9 = vector.shape_cast %8 : vector<1x1x32xf32> to vector<1x32xf32>
    %c1_14 = arith.constant 1 : index
    %c0_15 = arith.constant 0 : index
    %c0_16 = arith.constant 0 : index
    %10 = vector.load %arg4[%c1_14, %c0_15, %c0_16] : memref<2x1x32xf32, #tpu.memory_space<vmem>>, vector<1x1x32xf32>
    %11 = vector.shape_cast %10 : vector<1x1x32xf32> to vector<1x32xf32>
    %c0_17 = arith.constant 0 : index
    %c0_18 = arith.constant 0 : index
    %12 = vector.load %arg5[%c0_17, %c0_18] : memref<32x4xbf16, #tpu.memory_space<vmem>>, vector<32x4xbf16>
    %c0_19 = arith.constant 0 : index
    %c0_20 = arith.constant 0 : index
    %13 = vector.load %arg6[%c0_19, %c0_20] : memref<1x4xf32, #tpu.memory_space<vmem>>, vector<1x4xf32>
    %14 = vector.extract_strided_slice %0 {offsets = [0, 28], sizes = [6, 4], strides = [1, 1]} : vector<6x32xf32> to vector<6x4xf32>
    %15 = arith.truncf %14 : vector<6x4xf32> to vector<6x4xbf16>
    %cst = arith.constant dense<0.000000e+00> : vector<6x32xf32>
    %16 = tpu.matmul %15, %1, %cst {dimension_numbers = #tpu.dot_dimension_numbers<[1], [0], [0], [1], [0, 0, 1, 1], [], []>} : vector<6x4xbf16>, vector<4x32xbf16>, vector<6x32xf32> -> vector<6x32xf32>
    %cst_21 = arith.constant 0.000000e+00 : f32
    %17 = vector.broadcast %cst_21 : f32 to vector<1x32xf32>
    %cst_22 = arith.constant 0.000000e+00 : f32
    %18 = vector.broadcast %cst_22 : f32 to vector<1x32xf32>
    %19 = vector.extract_strided_slice %16 {offsets = [0, 0], sizes = [1, 32], strides = [1, 1]} : vector<6x32xf32> to vector<1x32xf32>
    %20 = arith.truncf %17 : vector<1x32xf32> to vector<1x32xbf16>
    %cst_23 = arith.constant dense<0.000000e+00> : vector<1x32xf32>
    %21 = tpu.matmul %20, %3, %cst_23 {dimension_numbers = #tpu.dot_dimension_numbers<[1], [0], [0], [1], [0, 0, 1, 1], [], []>} : vector<1x32xbf16>, vector<32x32xbf16>, vector<1x32xf32> -> vector<1x32xf32>
    %22 = arith.addf %19, %21 : vector<1x32xf32>
    %23 = arith.addf %22, %9 : vector<1x32xf32>
    %24 = math.tanh %23 : vector<1x32xf32>
    %25 = arith.truncf %24 : vector<1x32xf32> to vector<1x32xbf16>
    %cst_24 = arith.constant dense<0.000000e+00> : vector<1x32xf32>
    %26 = tpu.matmul %25, %7, %cst_24 {dimension_numbers = #tpu.dot_dimension_numbers<[1], [0], [0], [1], [0, 0, 1, 1], [], []>} : vector<1x32xbf16>, vector<32x32xbf16>, vector<1x32xf32> -> vector<1x32xf32>
    %27 = arith.truncf %18 : vector<1x32xf32> to vector<1x32xbf16>
    %cst_25 = arith.constant dense<0.000000e+00> : vector<1x32xf32>
    %28 = tpu.matmul %27, %5, %cst_25 {dimension_numbers = #tpu.dot_dimension_numbers<[1], [0], [0], [1], [0, 0, 1, 1], [], []>} : vector<1x32xbf16>, vector<32x32xbf16>, vector<1x32xf32> -> vector<1x32xf32>
    %29 = arith.addf %26, %28 : vector<1x32xf32>
    %30 = arith.addf %29, %11 : vector<1x32xf32>
    %31 = math.tanh %30 : vector<1x32xf32>
    %32 = vector.extract_strided_slice %16 {offsets = [1, 0], sizes = [1, 32], strides = [1, 1]} : vector<6x32xf32> to vector<1x32xf32>
    %33 = arith.truncf %24 : vector<1x32xf32> to vector<1x32xbf16>
    %cst_26 = arith.constant dense<0.000000e+00> : vector<1x32xf32>
    %34 = tpu.matmul %33, %3, %cst_26 {dimension_numbers = #tpu.dot_dimension_numbers<[1], [0], [0], [1], [0, 0, 1, 1], [], []>} : vector<1x32xbf16>, vector<32x32xbf16>, vector<1x32xf32> -> vector<1x32xf32>
    %35 = arith.addf %32, %34 : vector<1x32xf32>
    %36 = arith.addf %35, %9 : vector<1x32xf32>
    %37 = math.tanh %36 : vector<1x32xf32>
    %38 = arith.truncf %37 : vector<1x32xf32> to vector<1x32xbf16>
    %cst_27 = arith.constant dense<0.000000e+00> : vector<1x32xf32>
    %39 = tpu.matmul %38, %7, %cst_27 {dimension_numbers = #tpu.dot_dimension_numbers<[1], [0], [0], [1], [0, 0, 1, 1], [], []>} : vector<1x32xbf16>, vector<32x32xbf16>, vector<1x32xf32> -> vector<1x32xf32>
    %40 = arith.truncf %31 : vector<1x32xf32> to vector<1x32xbf16>
    %cst_28 = arith.constant dense<0.000000e+00> : vector<1x32xf32>
    %41 = tpu.matmul %40, %5, %cst_28 {dimension_numbers = #tpu.dot_dimension_numbers<[1], [0], [0], [1], [0, 0, 1, 1], [], []>} : vector<1x32xbf16>, vector<32x32xbf16>, vector<1x32xf32> -> vector<1x32xf32>
    %42 = arith.addf %39, %41 : vector<1x32xf32>
    %43 = arith.addf %42, %11 : vector<1x32xf32>
    %44 = math.tanh %43 : vector<1x32xf32>
    %45 = vector.extract_strided_slice %16 {offsets = [2, 0], sizes = [1, 32], strides = [1, 1]} : vector<6x32xf32> to vector<1x32xf32>
    %46 = arith.truncf %37 : vector<1x32xf32> to vector<1x32xbf16>
    %cst_29 = arith.constant dense<0.000000e+00> : vector<1x32xf32>
    %47 = tpu.matmul %46, %3, %cst_29 {dimension_numbers = #tpu.dot_dimension_numbers<[1], [0], [0], [1], [0, 0, 1, 1], [], []>} : vector<1x32xbf16>, vector<32x32xbf16>, vector<1x32xf32> -> vector<1x32xf32>
    %48 = arith.addf %45, %47 : vector<1x32xf32>
    %49 = arith.addf %48, %9 : vector<1x32xf32>
    %50 = math.tanh %49 : vector<1x32xf32>
    %51 = arith.truncf %50 : vector<1x32xf32> to vector<1x32xbf16>
    %cst_30 = arith.constant dense<0.000000e+00> : vector<1x32xf32>
    %52 = tpu.matmul %51, %7, %cst_30 {dimension_numbers = #tpu.dot_dimension_numbers<[1], [0], [0], [1], [0, 0, 1, 1], [], []>} : vector<1x32xbf16>, vector<32x32xbf16>, vector<1x32xf32> -> vector<1x32xf32>
    %53 = arith.truncf %44 : vector<1x32xf32> to vector<1x32xbf16>
    %cst_31 = arith.constant dense<0.000000e+00> : vector<1x32xf32>
    %54 = tpu.matmul %53, %5, %cst_31 {dimension_numbers = #tpu.dot_dimension_numbers<[1], [0], [0], [1], [0, 0, 1, 1], [], []>} : vector<1x32xbf16>, vector<32x32xbf16>, vector<1x32xf32> -> vector<1x32xf32>
    %55 = arith.addf %52, %54 : vector<1x32xf32>
    %56 = arith.addf %55, %11 : vector<1x32xf32>
    %57 = math.tanh %56 : vector<1x32xf32>
    %58 = vector.extract_strided_slice %16 {offsets = [3, 0], sizes = [1, 32], strides = [1, 1]} : vector<6x32xf32> to vector<1x32xf32>
    %59 = arith.truncf %50 : vector<1x32xf32> to vector<1x32xbf16>
    %cst_32 = arith.constant dense<0.000000e+00> : vector<1x32xf32>
    %60 = tpu.matmul %59, %3, %cst_32 {dimension_numbers = #tpu.dot_dimension_numbers<[1], [0], [0], [1], [0, 0, 1, 1], [], []>} : vector<1x32xbf16>, vector<32x32xbf16>, vector<1x32xf32> -> vector<1x32xf32>
    %61 = arith.addf %58, %60 : vector<1x32xf32>
    %62 = arith.addf %61, %9 : vector<1x32xf32>
    %63 = math.tanh %62 : vector<1x32xf32>
    %64 = arith.truncf %63 : vector<1x32xf32> to vector<1x32xbf16>
    %cst_33 = arith.constant dense<0.000000e+00> : vector<1x32xf32>
    %65 = tpu.matmul %64, %7, %cst_33 {dimension_numbers = #tpu.dot_dimension_numbers<[1], [0], [0], [1], [0, 0, 1, 1], [], []>} : vector<1x32xbf16>, vector<32x32xbf16>, vector<1x32xf32> -> vector<1x32xf32>
    %66 = arith.truncf %57 : vector<1x32xf32> to vector<1x32xbf16>
    %cst_34 = arith.constant dense<0.000000e+00> : vector<1x32xf32>
    %67 = tpu.matmul %66, %5, %cst_34 {dimension_numbers = #tpu.dot_dimension_numbers<[1], [0], [0], [1], [0, 0, 1, 1], [], []>} : vector<1x32xbf16>, vector<32x32xbf16>, vector<1x32xf32> -> vector<1x32xf32>
    %68 = arith.addf %65, %67 : vector<1x32xf32>
    %69 = arith.addf %68, %11 : vector<1x32xf32>
    %70 = math.tanh %69 : vector<1x32xf32>
    %71 = vector.extract_strided_slice %16 {offsets = [4, 0], sizes = [1, 32], strides = [1, 1]} : vector<6x32xf32> to vector<1x32xf32>
    %72 = arith.truncf %63 : vector<1x32xf32> to vector<1x32xbf16>
    %cst_35 = arith.constant dense<0.000000e+00> : vector<1x32xf32>
    %73 = tpu.matmul %72, %3, %cst_35 {dimension_numbers = #tpu.dot_dimension_numbers<[1], [0], [0], [1], [0, 0, 1, 1], [], []>} : vector<1x32xbf16>, vector<32x32xbf16>, vector<1x32xf32> -> vector<1x32xf32>
    %74 = arith.addf %71, %73 : vector<1x32xf32>
    %75 = arith.addf %74, %9 : vector<1x32xf32>
    %76 = math.tanh %75 : vector<1x32xf32>
    %77 = arith.truncf %76 : vector<1x32xf32> to vector<1x32xbf16>
    %cst_36 = arith.constant dense<0.000000e+00> : vector<1x32xf32>
    %78 = tpu.matmul %77, %7, %cst_36 {dimension_numbers = #tpu.dot_dimension_numbers<[1], [0], [0], [1], [0, 0, 1, 1], [], []>} : vector<1x32xbf16>, vector<32x32xbf16>, vector<1x32xf32> -> vector<1x32xf32>
    %79 = arith.truncf %70 : vector<1x32xf32> to vector<1x32xbf16>
    %cst_37 = arith.constant dense<0.000000e+00> : vector<1x32xf32>
    %80 = tpu.matmul %79, %5, %cst_37 {dimension_numbers = #tpu.dot_dimension_numbers<[1], [0], [0], [1], [0, 0, 1, 1], [], []>} : vector<1x32xbf16>, vector<32x32xbf16>, vector<1x32xf32> -> vector<1x32xf32>
    %81 = arith.addf %78, %80 : vector<1x32xf32>
    %82 = arith.addf %81, %11 : vector<1x32xf32>
    %83 = math.tanh %82 : vector<1x32xf32>
    %84 = vector.extract_strided_slice %16 {offsets = [5, 0], sizes = [1, 32], strides = [1, 1]} : vector<6x32xf32> to vector<1x32xf32>
    %85 = arith.truncf %76 : vector<1x32xf32> to vector<1x32xbf16>
    %cst_38 = arith.constant dense<0.000000e+00> : vector<1x32xf32>
    %86 = tpu.matmul %85, %3, %cst_38 {dimension_numbers = #tpu.dot_dimension_numbers<[1], [0], [0], [1], [0, 0, 1, 1], [], []>} : vector<1x32xbf16>, vector<32x32xbf16>, vector<1x32xf32> -> vector<1x32xf32>
    %87 = arith.addf %84, %86 : vector<1x32xf32>
    %88 = arith.addf %87, %9 : vector<1x32xf32>
    %89 = math.tanh %88 : vector<1x32xf32>
    %90 = arith.truncf %89 : vector<1x32xf32> to vector<1x32xbf16>
    %cst_39 = arith.constant dense<0.000000e+00> : vector<1x32xf32>
    %91 = tpu.matmul %90, %7, %cst_39 {dimension_numbers = #tpu.dot_dimension_numbers<[1], [0], [0], [1], [0, 0, 1, 1], [], []>} : vector<1x32xbf16>, vector<32x32xbf16>, vector<1x32xf32> -> vector<1x32xf32>
    %92 = arith.truncf %83 : vector<1x32xf32> to vector<1x32xbf16>
    %cst_40 = arith.constant dense<0.000000e+00> : vector<1x32xf32>
    %93 = tpu.matmul %92, %5, %cst_40 {dimension_numbers = #tpu.dot_dimension_numbers<[1], [0], [0], [1], [0, 0, 1, 1], [], []>} : vector<1x32xbf16>, vector<32x32xbf16>, vector<1x32xf32> -> vector<1x32xf32>
    %94 = arith.addf %91, %93 : vector<1x32xf32>
    %95 = arith.addf %94, %11 : vector<1x32xf32>
    %96 = math.tanh %95 : vector<1x32xf32>
    %97 = arith.truncf %96 : vector<1x32xf32> to vector<1x32xbf16>
    %cst_41 = arith.constant dense<0.000000e+00> : vector<1x4xf32>
    %98 = tpu.matmul %97, %12, %cst_41 {dimension_numbers = #tpu.dot_dimension_numbers<[1], [0], [0], [1], [0, 0, 1, 1], [], []>} : vector<1x32xbf16>, vector<32x4xbf16>, vector<1x4xf32> -> vector<1x4xf32>
    %99 = arith.addf %98, %13 : vector<1x4xf32>
    %c0_42 = arith.constant 0 : index
    %c0_43 = arith.constant 0 : index
    %100 = vector.load %arg7[%c0_42, %c0_43] : memref<1x4xf32, #tpu.memory_space<vmem>>, vector<1x4xf32>
    tpu.vector_store %arg7[%c0_42, %c0_43], %99 {strides = array<i32>} : memref<1x4xf32, #tpu.memory_space<vmem>>, vector<1x4xf32>,
    return
  }
}

</mosaic_0001>

<bundles_post_ra>
// kernel: my_own_rnn_forward.1
= control target key start
LH: loop header
LB: loop body
LE: loop exit
PB: predicated region body
PF: predicated region fallthrough
CT: control target
= control target key end

     0   :  { %12 = vsyncpa [#allocation3], 0  ;;  %s1673_s0 = inlined_call_operand.vmem [shape: f32[6,32], index: 0, kind: input, shape index: {}]   ;;  %s1674_s1 = inlined_call_operand.vmem [shape: bf16[4,32], index: 1, kind: input, shape index: {}]   ;;  %s1675_s2 = inlined_call_operand.vmem [shape: bf16[1,32,32], index: 2, kind: input, shape index: {}]   ;;  %s1676_s3 = inlined_call_operand.hbm [shape: bf16[2,32,32], index: 3, kind: input, shape index: {}]   ;;  %s1677_s4 = inlined_call_operand.vmem [shape: f32[2,1,32], index: 4, kind: input, shape index: {}]   ;;  %s1678_s5 = inlined_call_operand.vmem [shape: bf16[32,4], index: 5, kind: input, shape index: {}]   ;;  %s1679_s6 = inlined_call_operand.hbm [shape: f32[1,4], index: 6, kind: input, shape index: {}]   ;;  %s1680_s7 = inlined_call_operand.hbm [shape: f32[1,4], index: 7, kind: output, shape index: {}]  }
   0x1   :  { %13 = vsyncpa [#allocation6], 0 }
   0x2   :  { %14 = vsyncpa [#allocation4], 0  ;;  %s1424_s24 = smov [#allocation2]  }
   0x3   :  { %s26_s25 = sshll.u32 %s1424_s24, 4  ;;  %s27_s25 = int_to_ptr.vmem [resolvable:$true] %s26_s25 }
   0x4   :  { %s1366_s26 = scalar_lea.vmem %s27_s25, 512  ;;  %p1371_p1 = scmp.lt.s32.totalorder %s27_s25, %s27_s25 }
   0x5   :  { %p1367_p0 = scmp.ne.s32.totalorder %s27_s25, %s1366_s26  ;;  %p1372_p2 = scmp.lt.s32.totalorder %s1366_s26, %s1366_s26 }
   0x7   :  { %p1373_p3 = por %p1372_p2, %p1371_p1 }
   0x9   :  { %p1374_p4 = pnand %p1373_p3, %p1367_p0 }
   0xb   :  { %1377 = shalt.err (!%p1374_p4)
}
   0xc   :  { %s1425_s27 = smov 64   ;;  %s1426_s28 = smov 4  }
   0xd   :  { %32 = dma.hbm_to_vmem [thread:$0]  %s1676_s3, 512, %s27_s25, [#allocation3], %s1425_s27, %s1425_s27, %s1426_s28  }
   0xe   :  { %s1427_s8 = smov [#allocation5]  }
   0xf   :  { %s43_s9 = sshll.u32 %s1427_s8, 4  ;;  %s44_s9 = int_to_ptr.vmem [resolvable:$true] %s43_s9 }
  0x10   :  { %s1386_s10 = scalar_lea.vmem %s44_s9, 16  ;;  %s1390_s11 = scalar_lea.vmem %s44_s9, 32 }
  0x11   :  { %p1387_p5 = scmp.ne.s32.totalorder %s44_s9, %s1386_s10  ;;  %p1391_p6 = scmp.lt.s32.totalorder %s44_s9, %s44_s9 }
  0x12   :  { %p1392_p7 = scmp.lt.s32.totalorder %s1390_s11, %s1386_s10 }
  0x14   :  { %p1393_p8 = por %p1392_p7, %p1391_p6 }
  0x16   :  { %p1394_p9 = pnand %p1393_p8, %p1387_p5 }
  0x18   :  { %1397 = shalt.err (!%p1394_p9)
}
  0x19   :  { %46 = dma.hbm_to_vmem [thread:$0]  %s1679_s6, 16, %s44_s9, [#allocation6]  }
  0x1a   :  { %1418 = dma.done.wait [#allocation3], 512  }
  0x1b   :  { %1419 = vsyncadd [#allocation3], 4294966784 }
  0x1c   :  { %1420 = dma.done.wait [#allocation6], 16  }
  0x1d   :  { %1421 = vsyncadd [#allocation6], 4294967280  ;;  %v1428_v0 = vmov 0.0   ;;  %vm1429_vm0 = vmmov 0   ;;  %vm85_vm1 = vcmask 1041408   ;;  %v1488_v3 = vld [vmem:[#allocation2 + $0x8] sm:$0xff]   ;;  %v343_v30 = vlaneseq }
  0x1e   :  { %1165 = vmatprep.subr.bf16.mxu1 %v1428_v0  ;;  %1169 = vmatprep.mubr.msk.bf16.mxu1 %vm1429_vm0, %v1428_v0  ;;  %v54_v1 = vld [vmem:[%s1673_s0] sm:$0x3f]  ;;  %s1430_s16 = smov 100   ;;  %v1431_v7 = vmov 0   ;;  %vm81_vm2 = vcmask 31744   ;;  %v1504_v9 = vld [vmem:[#allocation2 + $0x18] sm:$0xff]  }
  0x1f   :  { %1159 = vmatprep.subr.bf16.mxu0 %v1428_v0  ;;  %1161 = vmatprep.mubr.msk.bf16.mxu0 %vm1429_vm0, %v1428_v0  ;;  %v77_v2 = vpack.c.bf16 %v54_v1, %v54_v1  ;;  %v55_v4 = vld [vmem:[%s1674_s1] sm:$0x3]  ;;  %v1508_v10 = vld [vmem:[#allocation2 + $0x10] sm:$0xff]   ;;  %v1515_v11 = vld [vmem:[%s1675_s2 + $0x8] sm:$0xff]   ;;  %vm141_vm3 = vcmask 261120   ;;  %v344_v31 = vshrl.u32 %v343_v30, 7 }
  0x20   :  { %1166 = vmatpush3.bf16.msra.mxu1 %v1488_v3  ;;  %v1494_v5 = vld [vmem:[#allocation2] sm:$0xff]   ;;  %v87_v6 = vsel %vm85_vm1, %v55_v4, 0  ;;  %s1432_s25 = smov [#allocation7]   ;;  %vm1055_vm4 = vcmask 24576  }
  0x21   :  { %79 = vrot.lane.b32.xlu0 %v77_v2, %s1430_s16  ;;  %1167 = vmatprep.subr.bf16.mxu1 %v1428_v0  ;;  %v1522_v12 = vld [vmem:[%s1675_s2] sm:$0xff]   ;;  %v345_v32 = vsub.s32 0, %v344_v31 }
  0x22   :  { %1160 = vmatpush3.bf16.msra.mxu0 %v87_v6  ;;  %v69_v17 = vld [vmem:[%s1677_s4] sm:$0x1]  ;;  %v1555_v33 = vld [vmem:[%s1677_s4 + $0x1] sm:$0x1] }
  0x23   :  { %1173 = vmatprep.subr.bf16.mxu0 %v1428_v0  ;;  %v1557_v36 = vrot.slane %v69_v17, %v345_v32 }
  0x24   :  { %1168 = vmatpush3.bf16.msra.mxu1 %v1494_v5 }
  0x25   :  { %1181 = vmatprep.subr.bf16.mxu1 %v1428_v0 }
  0x27   :  { %1170 = vmatmul.mubr.bf16.vlgmr.msra.gmra.mxu1 %v1431_v7 }
  0x28   :  { %1185 = vmatprep.mubr.msk.bf16.mxu1 %vm1429_vm0, %v1428_v0  ;;  %1182 = vmatpush3.bf16.msra.mxu1 %v1515_v11 }
  0x29   :  { %1183 = vmatprep.subr.bf16.mxu1 %v1428_v0 }
  0x2c   :  { %1184 = vmatpush3.bf16.msra.mxu1 %v1522_v12 }
  0x2d   :  { %1197 = vmatprep.subr.bf16.mxu1 %v1428_v0 }
  0x93   :  { %v80_v8 = vpop.permute.xlu0 %79 }
  0x94   :  { %1162 = vmatmul.mubr.msk.bf16.vlgmr.msra.gmra.mxu0 %vm81_vm2, %v80_v8 }
  0x95   :  { %1177 = vmatprep.mubr.msk.bf16.mxu0 %vm1429_vm0, %v1428_v0  ;;  %1174 = vmatpush3.bf16.msra.mxu0 %v1504_v9 }
  0x96   :  { %1175 = vmatprep.subr.bf16.mxu0 %v1428_v0 }
  0x99   :  { %1176 = vmatpush3.bf16.msra.mxu0 %v1508_v10 }
  0x9a   :  { %1189 = vmatprep.subr.bf16.mxu0 %v1428_v0 }
  0x9c   :  { %1178 = vmatmul.mubr.bf16.vlgmr.msra.gmra.mxu0 %v1431_v7 }
  0x9d   :  { %1190 = vmatpush3.bf16.msra.mxu0 %v1488_v3  ;;  %1193 = vmatprep.mubr.msk.bf16.mxu0 %vm1429_vm0, %v1428_v0 }
  0x9e   :  { %1191 = vmatprep.subr.bf16.mxu0 %v1428_v0 }
  0xa1   :  { %1192 = vmatpush3.bf16.msra.mxu0 %v1494_v5 }
  0xa2   :  { %1205 = vmatprep.subr.bf16.mxu0 %v1428_v0 }
  0xe7   :  { %v179_v13 = vpop.f32.mrf.mxu1 }
  0xe9   :  { %v1171_v14 = vpop.f32.mrf.mxu1 }
  0xeb   :  { %v182_v15 = vpop.f32.mrf.mxu1 }
  0xed   :  { %v1172_v16 = vpop.f32.mrf.mxu1 }
 0x154   :  { %v1535_v18 = vpop.f32.mrf.mxu0 }
 0x155   :  { %v185_v19 = vadd.f32 %v179_v13, %v1535_v18 }
 0x156   :  { %v1163_v20 = vpop.f32.mrf.mxu0 }
 0x157   :  { %v186_v21 = vadd.f32 %v185_v19, %v69_v17 }
 0x158   :  { %v126_v22 = vpop.f32.mrf.mxu0 }
 0x159   :  { %1334 = vtanh.f32 %v186_v21 }
 0x15a   :  { %v1164_v23 = vpop.f32.mrf.mxu0 }
 0x15c   :  { %v235_v26 = vpop.f32.mrf.mxu0 }
 0x15e   :  { %v1179_v27 = vpop.f32.mrf.mxu0 }
 0x160   :  { %v238_v28 = vpop.f32.mrf.mxu0 }
 0x162   :  { %v1180_v29 = vpop.f32.mrf.mxu0 }
 0x166   :  { %v1335_v24 = vpop.eup %1334 }
 0x167   :  { %v188_v25 = vpack.c.bf16 %v1335_v24, %v1335_v24 }
 0x169   :  { %1186 = vmatmul.mubr.msk.bf16.vlgmr.msra.gmra.mxu1 %vm141_vm3, %v188_v25  ;;  %1194 = vmatmul.mubr.msk.bf16.vlgmr.msra.gmra.mxu0 %vm141_vm3, %v188_v25 }
 0x16a   :  { %1198 = vmatpush3.bf16.msra.mxu1 %v1504_v9  ;;  %1206 = vmatpush3.bf16.msra.mxu0 %v1515_v11 }
 0x16b   :  { %1199 = vmatprep.subr.bf16.mxu1 %v1428_v0  ;;  %1201 = vmatprep.mubr.msk.bf16.mxu1 %vm1429_vm0, %v1428_v0 }
 0x16c   :  { %1207 = vmatprep.subr.bf16.mxu0 %v1428_v0  ;;  %1209 = vmatprep.mubr.msk.bf16.mxu0 %vm1429_vm0, %v1428_v0 }
 0x16e   :  { %1200 = vmatpush3.bf16.msra.mxu1 %v1508_v10  ;;  %1208 = vmatpush3.bf16.msra.mxu0 %v1522_v12 }
 0x16f   :  { %1213 = vmatprep.subr.bf16.mxu1 %v1428_v0  ;;  %1221 = vmatprep.subr.bf16.mxu0 %v1428_v0 }
 0x229   :  { %v290_v34 = vpop.f32.mrf.mxu1  ;;  %v332_v35 = vpop.f32.mrf.mxu0 }
 0x22a   :  { %v291_v37 = vadd.f32 %v290_v34, %v235_v26  ;;  %v339_v38 = vrot.slane %v332_v35, 7 }
 0x22b   :  { %v1187_v39 = vpop.f32.mrf.mxu1  ;;  %v1195_v40 = vpop.f32.mrf.mxu0 }
 0x22c   :  { %v296_v41 = vadd.f32 %v1555_v33, %v291_v37  ;;  %v341_v42 = vadd.f32 %v339_v38, %v1535_v18 }
 0x22d   :  { %v293_v43 = vpop.f32.mrf.mxu1  ;;  %v335_v44 = vpop.f32.mrf.mxu0 }
 0x22e   :  { %1336 = vtanh.f32 %v296_v41  ;;  %v348_v45 = vadd.f32 %v1557_v36, %v341_v42 }
 0x22f   :  { %v1188_v46 = vpop.f32.mrf.mxu1  ;;  %v1196_v47 = vpop.f32.mrf.mxu0 }
 0x230   :  { %1338 = vtanh.f32 %v348_v45 }
 0x23b   :  { %v1337_v48 = vpop.eup %1336 }
 0x23c   :  { %v351_v49 = vpack.c.bf16 %v1337_v48, %v1337_v48 }
 0x23d   :  { %v1339_v50 = vpop.eup %1338 }
 0x23e   :  { %v350_v51 = vpack.c.bf16 %v1339_v50, %v1339_v50  ;;  %1202 = vmatmul.mubr.msk.bf16.vlgmr.msra.gmra.mxu1 %vm141_vm3, %v351_v49 }
 0x23f   :  { %1214 = vmatpush3.bf16.msra.mxu1 %v1488_v3  ;;  %1217 = vmatprep.mubr.msk.bf16.mxu1 %vm1429_vm0, %v1428_v0 }
 0x240   :  { %v396_v52 = vshrl.u32 %v350_v51, 16  ;;  %1215 = vmatprep.subr.bf16.mxu1 %v1428_v0 }
 0x242   :  { %1210 = vmatmul.mubr.msk.bf16.vlgmr.msra.gmra.mxu0 %vm141_vm3, %v396_v52 }
 0x243   :  { %1216 = vmatpush3.bf16.msra.mxu1 %v1494_v5  ;;  %1222 = vmatpush3.bf16.msra.mxu0 %v1504_v9 }
 0x244   :  { %1223 = vmatprep.subr.bf16.mxu0 %v1428_v0  ;;  %1225 = vmatprep.mubr.msk.bf16.mxu0 %vm1429_vm0, %v1428_v0 }
 0x245   :  { %1229 = vmatprep.subr.bf16.mxu1 %v1428_v0 }
 0x246   :  { %1218 = vmatmul.mubr.msk.bf16.vlgmr.msra.gmra.mxu1 %vm141_vm3, %v396_v52 }
 0x247   :  { %1224 = vmatpush3.bf16.msra.mxu0 %v1508_v10  ;;  %1230 = vmatpush3.bf16.msra.mxu1 %v1515_v11 }
 0x248   :  { %1237 = vmatprep.subr.bf16.mxu0 %v1428_v0  ;;  %1231 = vmatprep.subr.bf16.mxu1 %v1428_v0 }
 0x249   :  { %1233 = vmatprep.mubr.msk.bf16.mxu1 %vm1429_vm0, %v1428_v0 }
 0x24b   :  { %1232 = vmatpush3.bf16.msra.mxu1 %v1522_v12 }
 0x24c   :  { %1245 = vmatprep.subr.bf16.mxu1 %v1428_v0 }
 0x2fe   :  { %v389_v53 = vpop.f32.mrf.mxu1 }
 0x300   :  { %v1203_v54 = vpop.f32.mrf.mxu1 }
 0x302   :  { %v392_v55 = vpop.f32.mrf.mxu1  ;;  %v435_v56 = vpop.f32.mrf.mxu0 }
 0x303   :  { %v436_v57 = vadd.f32 %v435_v56, %v389_v53 }
 0x304   :  { %v1204_v58 = vpop.f32.mrf.mxu1  ;;  %v1211_v59 = vpop.f32.mrf.mxu0 }
 0x305   :  { %v441_v60 = vadd.f32 %v1555_v33, %v436_v57 }
 0x306   :  { %v438_v61 = vpop.f32.mrf.mxu0  ;;  %v477_v62 = vpop.f32.mrf.mxu1 }
 0x307   :  { %1340 = vtanh.f32 %v441_v60  ;;  %v484_v63 = vrot.slane %v477_v62, 6 }
 0x308   :  { %v1212_v1 = vpop.f32.mrf.mxu0  ;;  %v1219_v2 = vpop.f32.mrf.mxu1 }
 0x309   :  { %v486_v4 = vadd.f32 %v484_v63, %v1535_v18 }
 0x30a   :  { %v480_v6 = vpop.f32.mrf.mxu1 }
 0x30b   :  { %v487_v7 = vadd.f32 %v486_v4, %v1557_v36 }
 0x30c   :  { %v1220_v8 = vpop.f32.mrf.mxu1 }
 0x30d   :  { %1342 = vtanh.f32 %v487_v7 }
 0x314   :  { %v1341_v13 = vpop.eup %1340 }
 0x315   :  { %v490_v14 = vpack.c.bf16 %v1341_v13, %v1341_v13 }
 0x317   :  { %1226 = vmatmul.mubr.msk.bf16.vlgmr.msra.gmra.mxu0 %vm141_vm3, %v490_v14 }
 0x318   :  { %1238 = vmatpush3.bf16.msra.mxu0 %v1488_v3  ;;  %1241 = vmatprep.mubr.msk.bf16.mxu0 %vm1429_vm0, %v1428_v0 }
 0x319   :  { %1239 = vmatprep.subr.bf16.mxu0 %v1428_v0 }
 0x31a   :  { %v1343_v15 = vpop.eup %1342 }
 0x31b   :  { %v489_v16 = vpack.c.bf16 %v1343_v15, %v1343_v15 }
 0x31c   :  { %1240 = vmatpush3.bf16.msra.mxu0 %v1494_v5 }
 0x31d   :  { %v535_v17 = vrot.slane %v489_v16, 1  ;;  %1253 = vmatprep.subr.bf16.mxu0 %v1428_v0 }
 0x31f   :  { %1234 = vmatmul.mubr.msk.bf16.vlgmr.msra.gmra.mxu1 %vm141_vm3, %v535_v17  ;;  %1242 = vmatmul.mubr.msk.bf16.vlgmr.msra.gmra.mxu0 %vm141_vm3, %v535_v17 }
 0x320   :  { %1246 = vmatpush3.bf16.msra.mxu1 %v1504_v9  ;;  %1254 = vmatpush3.bf16.msra.mxu0 %v1515_v11 }
 0x321   :  { %1247 = vmatprep.subr.bf16.mxu1 %v1428_v0  ;;  %1249 = vmatprep.mubr.msk.bf16.mxu1 %vm1429_vm0, %v1428_v0 }
 0x322   :  { %1255 = vmatprep.subr.bf16.mxu0 %v1428_v0  ;;  %1257 = vmatprep.mubr.msk.bf16.mxu0 %vm1429_vm0, %v1428_v0 }
 0x324   :  { %1248 = vmatpush3.bf16.msra.mxu1 %v1508_v10  ;;  %1256 = vmatpush3.bf16.msra.mxu0 %v1522_v12 }
 0x325   :  { %1261 = vmatprep.subr.bf16.mxu1 %v1428_v0  ;;  %1269 = vmatprep.subr.bf16.mxu0 %v1428_v0 }
 0x3d7   :  { %v528_v19 = vpop.f32.mrf.mxu0 }
 0x3d9   :  { %v1227_v20 = vpop.f32.mrf.mxu0 }
 0x3db   :  { %v531_v21 = vpop.f32.mrf.mxu0 }
 0x3dd   :  { %v1228_v22 = vpop.f32.mrf.mxu0 }
 0x3df   :  { %v573_v23 = vpop.f32.mrf.mxu1  ;;  %v615_v24 = vpop.f32.mrf.mxu0 }
 0x3e0   :  { %v574_v25 = vadd.f32 %v573_v23, %v528_v19  ;;  %v622_v26 = vrot.slane %v615_v24, 5 }
 0x3e1   :  { %v1235_v27 = vpop.f32.mrf.mxu1  ;;  %v1243_v28 = vpop.f32.mrf.mxu0 }
 0x3e2   :  { %v579_v29 = vadd.f32 %v1555_v33, %v574_v25  ;;  %v624_v30 = vadd.f32 %v622_v26, %v1535_v18 }
 0x3e3   :  { %v576_v31 = vpop.f32.mrf.mxu1  ;;  %v618_v32 = vpop.f32.mrf.mxu0 }
 0x3e4   :  { %1344 = vtanh.f32 %v579_v29  ;;  %v625_v34 = vadd.f32 %v624_v30, %v1557_v36 }
 0x3e5   :  { %v1236_v35 = vpop.f32.mrf.mxu1  ;;  %v1244_v37 = vpop.f32.mrf.mxu0 }
 0x3e6   :  { %1346 = vtanh.f32 %v625_v34 }
 0x3f1   :  { %v1345_v38 = vpop.eup %1344 }
 0x3f2   :  { %v628_v39 = vpack.c.bf16 %v1345_v38, %v1345_v38 }
 0x3f3   :  { %v1347_v40 = vpop.eup %1346 }
 0x3f4   :  { %v627_v41 = vpack.c.bf16 %v1347_v40, %v1347_v40  ;;  %1250 = vmatmul.mubr.msk.bf16.vlgmr.msra.gmra.mxu1 %vm141_vm3, %v628_v39 }
 0x3f5   :  { %1262 = vmatpush3.bf16.msra.mxu1 %v1488_v3  ;;  %1265 = vmatprep.mubr.msk.bf16.mxu1 %vm1429_vm0, %v1428_v0 }
 0x3f6   :  { %v673_v42 = vshrl.u32 %v627_v41, 16  ;;  %1263 = vmatprep.subr.bf16.mxu1 %v1428_v0 }
 0x3f8   :  { %v675_v43 = vrot.slane %v673_v42, 1 }
 0x3f9   :  { %1264 = vmatpush3.bf16.msra.mxu1 %v1494_v5 }
 0x3fa   :  { %1258 = vmatmul.mubr.msk.bf16.vlgmr.msra.gmra.mxu0 %vm141_vm3, %v675_v43  ;;  %1277 = vmatprep.subr.bf16.mxu1 %v1428_v0 }
 0x3fb   :  { %1270 = vmatpush3.bf16.msra.mxu0 %v1504_v9  ;;  %1273 = vmatprep.mubr.msk.bf16.mxu0 %vm1429_vm0, %v1428_v0 }
 0x3fc   :  { %1266 = vmatmul.mubr.msk.bf16.vlgmr.msra.gmra.mxu1 %vm141_vm3, %v675_v43  ;;  %1271 = vmatprep.subr.bf16.mxu0 %v1428_v0 }
 0x3fd   :  { %1278 = vmatpush3.bf16.msra.mxu1 %v1515_v11  ;;  %1281 = vmatprep.mubr.msk.bf16.mxu1 %vm1429_vm0, %v1428_v0 }
 0x3fe   :  { %1279 = vmatprep.subr.bf16.mxu1 %v1428_v0 }
 0x3ff   :  { %1272 = vmatpush3.bf16.msra.mxu0 %v1508_v10 }
 0x400   :  { %1285 = vmatprep.subr.bf16.mxu0 %v1428_v0 }
 0x401   :  { %1280 = vmatpush3.bf16.msra.mxu1 %v1522_v12 }
 0x402   :  { %1293 = vmatprep.subr.bf16.mxu1 %v1428_v0 }
 0x4b4   :  { %v666_v44 = vpop.f32.mrf.mxu1 }
 0x4b6   :  { %v1251_v45 = vpop.f32.mrf.mxu1 }
 0x4b8   :  { %v669_v46 = vpop.f32.mrf.mxu1 }
 0x4ba   :  { %v1252_v47 = vpop.f32.mrf.mxu1  ;;  %v713_v48 = vpop.f32.mrf.mxu0 }
 0x4bb   :  { %v714_v49 = vadd.f32 %v713_v48, %v666_v44 }
 0x4bc   :  { %v1259_v50 = vpop.f32.mrf.mxu0  ;;  %v755_v51 = vpop.f32.mrf.mxu1 }
 0x4bd   :  { %v719_v52 = vadd.f32 %v1555_v33, %v714_v49  ;;  %v762_v53 = vrot.slane %v755_v51, 4 }
 0x4be   :  { %v716_v54 = vpop.f32.mrf.mxu0  ;;  %v1267_v55 = vpop.f32.mrf.mxu1 }
 0x4bf   :  { %1348 = vtanh.f32 %v719_v52  ;;  %v764_v56 = vadd.f32 %v762_v53, %v1535_v18 }
 0x4c0   :  { %v1260_v57 = vpop.f32.mrf.mxu0  ;;  %v758_v58 = vpop.f32.mrf.mxu1 }
 0x4c1   :  { %v765_v59 = vadd.f32 %v764_v56, %v1557_v36 }
 0x4c2   :  { %v1268_v60 = vpop.f32.mrf.mxu1 }
 0x4c3   :  { %1350 = vtanh.f32 %v765_v59 }
 0x4cc   :  { %v1349_v61 = vpop.eup %1348 }
 0x4cd   :  { %v768_v62 = vpack.c.bf16 %v1349_v61, %v1349_v61 }
 0x4cf   :  { %1274 = vmatmul.mubr.msk.bf16.vlgmr.msra.gmra.mxu0 %vm141_vm3, %v768_v62 }
 0x4d0   :  { %v1351_v63 = vpop.eup %1350  ;;  %1286 = vmatpush3.bf16.msra.mxu0 %v1488_v3  ;;  %1289 = vmatprep.mubr.msk.bf16.mxu0 %vm1429_vm0, %v1428_v0 }
 0x4d1   :  { %v767_v1 = vpack.c.bf16 %v1351_v63, %v1351_v63  ;;  %1287 = vmatprep.subr.bf16.mxu0 %v1428_v0 }
 0x4d3   :  { %v813_v2 = vrot.slane %v767_v1, 2 }
 0x4d4   :  { %1288 = vmatpush3.bf16.msra.mxu0 %v1494_v5 }
 0x4d5   :  { %1282 = vmatmul.mubr.msk.bf16.vlgmr.msra.gmra.mxu1 %vm141_vm3, %v813_v2  ;;  %1301 = vmatprep.subr.bf16.mxu0 %v1428_v0 }
 0x4d6   :  { %1294 = vmatpush3.bf16.msra.mxu1 %v1504_v9  ;;  %1297 = vmatprep.mubr.msk.bf16.mxu1 %vm1429_vm0, %v1428_v0 }
 0x4d7   :  { %1290 = vmatmul.mubr.msk.bf16.vlgmr.msra.gmra.mxu0 %vm141_vm3, %v813_v2  ;;  %1295 = vmatprep.subr.bf16.mxu1 %v1428_v0 }
 0x4d8   :  { %1302 = vmatpush3.bf16.msra.mxu0 %v1515_v11  ;;  %1305 = vmatprep.mubr.msk.bf16.mxu0 %vm1429_vm0, %v1428_v0 }
 0x4d9   :  { %1303 = vmatprep.subr.bf16.mxu0 %v1428_v0 }
 0x4da   :  { %1296 = vmatpush3.bf16.msra.mxu1 %v1508_v10 }
 0x4db   :  { %1309 = vmatprep.subr.bf16.mxu1 %v1428_v0 }
 0x4dc   :  { %1304 = vmatpush3.bf16.msra.mxu0 %v1522_v12 }
 0x58f   :  { %v806_v3 = vpop.f32.mrf.mxu0 }
 0x591   :  { %v1275_v5 = vpop.f32.mrf.mxu0 }
 0x593   :  { %v809_v9 = vpop.f32.mrf.mxu0 }
 0x595   :  { %v1276_v4 = vpop.f32.mrf.mxu0  ;;  %v851_v6 = vpop.f32.mrf.mxu1 }
 0x596   :  { %v852_v7 = vadd.f32 %v851_v6, %v806_v3 }
 0x597   :  { %v1283_v8 = vpop.f32.mrf.mxu1  ;;  %v893_v13 = vpop.f32.mrf.mxu0 }
 0x598   :  { %v857_v11 = vadd.f32 %v1555_v33, %v852_v7  ;;  %v900_v14 = vrot.slane %v893_v13, 3 }
 0x599   :  { %v854_v15 = vpop.f32.mrf.mxu1  ;;  %v1291_v16 = vpop.f32.mrf.mxu0 }
 0x59a   :  { %1352 = vtanh.f32 %v857_v11  ;;  %v902_v10 = vadd.f32 %v900_v14, %v1535_v18  ;;  %v1332_v18 = vld [vmem:[%s1678_s5 + $0x8] sm:$0xff]  }
 0x59b   :  { %v1284_v17 = vpop.f32.mrf.mxu1  ;;  %v896_v19 = vpop.f32.mrf.mxu0 }
 0x59c   :  { %v903_v12 = vadd.f32 %v902_v10, %v1557_v36  ;;  %v1333_v36 = vld [vmem:[%s1678_s5] sm:$0xff]   ;;  %s1063_s5 = sshll.u32 %s1432_s25, 4  ;;  %s1064_s5 = int_to_ptr.vmem [resolvable:$true] %s1063_s5 }
 0x59d   :  { %v1292_v20 = vpop.f32.mrf.mxu0  ;;  %s1398_s26 = scalar_lea.vmem %s1064_s5, 16  ;;  %s1402_s27 = scalar_lea.vmem %s1064_s5, 32 }
 0x59e   :  { %1354 = vtanh.f32 %v903_v12  ;;  %p1399_p10 = scmp.ne.s32.totalorder %s1064_s5, %s1398_s26  ;;  %p1403_p11 = scmp.lt.s32.totalorder %s1064_s5, %s1064_s5 }
 0x59f   :  { %p1404_p12 = scmp.lt.s32.totalorder %s1402_s27, %s1398_s26 }
 0x5a1   :  { %p1405_p13 = por %p1404_p12, %p1403_p11 }
 0x5a3   :  { %p1406_p0 = pnand %p1405_p13, %p1399_p10 }
 0x5a7   :  { %v1353_v21 = vpop.eup %1352 }
 0x5a8   :  { %v906_v22 = vpack.c.bf16 %v1353_v21, %v1353_v21 }
 0x5aa   :  { %1298 = vmatmul.mubr.msk.bf16.vlgmr.msra.gmra.mxu1 %vm141_vm3, %v906_v22 }
 0x5ab   :  { %v1355_v23 = vpop.eup %1354  ;;  %1313 = vmatprep.mubr.msk.bf16.mxu1 %vm1429_vm0, %v1428_v0  ;;  %1310 = vmatpush3.bf16.msra.mxu1 %v1332_v18 }
 0x5ac   :  { %v905_v24 = vpack.c.bf16 %v1355_v23, %v1355_v23  ;;  %1311 = vmatprep.subr.bf16.mxu1 %v1428_v0  ;;  %v76_v0 = vld [vmem:[#allocation5] sm:$0x1] }
 0x5ae   :  { %v951_v25 = vshrl.u32 %v905_v24, 16 }
 0x5af   :  { %1312 = vmatpush3.bf16.msra.mxu1 %v1333_v36 }
 0x5b0   :  { %v953_v26 = vrot.slane %v951_v25, 2 }
 0x5b2   :  { %1306 = vmatmul.mubr.msk.bf16.vlgmr.msra.gmra.mxu0 %vm141_vm3, %v953_v26 }
 0x66a   :  { %v944_v27 = vpop.f32.mrf.mxu1 }
 0x66c   :  { %v1299_v28 = vpop.f32.mrf.mxu1 }
 0x66e   :  { %v947_v29 = vpop.f32.mrf.mxu1 }
 0x670   :  { %v1300_v30 = vpop.f32.mrf.mxu1 }
 0x672   :  { %v991_v31 = vpop.f32.mrf.mxu0 }
 0x673   :  { %v992_v32 = vadd.f32 %v991_v31, %v944_v27 }
 0x674   :  { %v1307_v34 = vpop.f32.mrf.mxu0 }
 0x675   :  { %v997_v35 = vadd.f32 %v1555_v33, %v992_v32 }
 0x676   :  { %v994_v37 = vpop.f32.mrf.mxu0 }
 0x677   :  { %1356 = vtanh.f32 %v997_v35 }
 0x678   :  { %v1308_v38 = vpop.f32.mrf.mxu0 }
 0x684   :  { %v1357_v39 = vpop.eup %1356 }
 0x685   :  { %v999_v40 = vpack.c.bf16 %v1357_v39, %v1357_v39 }
 0x687   :  { %1314 = vmatmul.mubr.msk.bf16.vlgmr.msra.gmra.mxu1 %vm141_vm3, %v999_v40 }
 0x747   :  { %v1049_v41 = vpop.f32.mrf.mxu1 }
 0x748   :  { %v1050_v42 = vadd.f32 %v1049_v41, %v76_v0 }
 0x749   :  { %v1315_v43 = vpop.f32.mrf.mxu1 }
 0x74a   :  { %1056 = vst.msk [vmem:[#allocation7] sm:$0x1] %vm1055_vm4, %v1050_v42 }
 0x74b   :  { %v1052_v44 = vpop.f32.mrf.mxu1 }
 0x74c   :  { %1409 = shalt.err (!%p1406_p0)
}
 0x74d   :  { %1066 = dma.vmem_to_hbm [thread:$0]  %s1064_s5, 16, %s1680_s7, [#allocation4]   ;;  %v1316_v33 = vpop.f32.mrf.mxu1 }
 0x74e   :  { %1422 = dma.done.wait [#allocation4], 16  }
 0x74f   :  { %1423 = vsyncadd [#allocation4], 4294967280 }
 0x750   :  { %1070 = vsyncpa [#allocation3], 1 }
 0x751   :  { %1071 = vsyncpa [#allocation6], 1 }
 0x752   :  { %1072 = vsyncpa [#allocation4], 1 }

</bundles_post_ra>
